<compile_context>
chip_gen: v7x
topology: tpu7x:2x2x1
jax: 0.10.0
libtpu: 0.0.40
codegen_flags: <defaults>
</compile_context>

<pallas_src>
import functools

import jax
import jax.numpy as jnp
from jax.experimental import pallas as pl
from jax.experimental.pallas import tpu as pltpu


VMEM_LIMIT = 48 * 1024 * 1024  # fits v5e/v6e (128 MiB) and v7x (64 MiB) VMEM


def _cparams(*dims):
    return pltpu.CompilerParams(
        dimension_semantics=dims if dims else None,
        vmem_limit_bytes=VMEM_LIMIT,
    )


def _pick_tile(dim, cap, base):
    """Largest tile <= cap that is a multiple of `base` and divides `dim`."""
    t = (min(cap, dim) // base) * base
    while t >= base:
        if dim % t == 0:
            return t
        t -= base
    return dim


# ----------------------------- Pallas kernels ------------------------------ #

def _linear_kernel(x_ref, w_ref, b_ref, o_ref, acc_ref, *, activation):
    """Tiled matmul with f32 accumulator; bias + activation epilogue on last K step."""
    @pl.when(pl.program_id(2) == 0)
    def _():
        acc_ref[...] = jnp.zeros_like(acc_ref)

    acc_ref[...] += jnp.dot(x_ref[...], w_ref[...],
                            preferred_element_type=jnp.float32)

    @pl.when(pl.program_id(2) == pl.num_programs(2) - 1)
    def _():
        y = acc_ref[...] + b_ref[...]
        if activation == "relu":
            y = jnp.maximum(y, 0.0)
        o_ref[...] = y.astype(o_ref.dtype)


def linear(x, w, b, activation="none", out_dtype=None):
    """y = act(x @ w + b);  x:[M,K] bf16, w:[K,N] bf16, b:[N] f32 -> [M,N]."""
    M, K = x.shape
    _, N = w.shape
    out_dtype = out_dtype or x.dtype
    tm = _pick_tile(M, 256, 16)
    tn = _pick_tile(N, 512, 128)
    tk = _pick_tile(K, 512, 128)
    kernel = functools.partial(_linear_kernel, activation=activation)
    return pl.pallas_call(
        kernel,
        grid=(M // tm, N // tn, K // tk),
        in_specs=[
            pl.BlockSpec((tm, tk), lambda i, j, k: (i, k)),
            pl.BlockSpec((tk, tn), lambda i, j, k: (k, j)),
            pl.BlockSpec((1, tn), lambda i, j, k: (0, j)),
        ],
        out_specs=pl.BlockSpec((tm, tn), lambda i, j, k: (i, j)),
        out_shape=jax.ShapeDtypeStruct((M, N), out_dtype),
        scratch_shapes=[pltpu.VMEM((tm, tn), jnp.float32)],
        compiler_params=_cparams("parallel", "parallel", "arbitrary"),
    )(x, w, b.reshape(1, N))


def _layernorm_kernel(x_ref, g_ref, b_ref, o_ref, *, eps):
    x = x_ref[...].astype(jnp.float32)
    mu = jnp.mean(x, axis=-1, keepdims=True)
    var = jnp.mean(jnp.square(x - mu), axis=-1, keepdims=True)
    xn = (x - mu) * jax.lax.rsqrt(var + eps)
    o_ref[...] = (xn * g_ref[...] + b_ref[...]).astype(o_ref.dtype)


def layernorm(x, gamma, beta, eps, out_dtype):
    """LayerNorm(x) over last dim (no residual input)."""
    M, H = x.shape
    tm = _pick_tile(M, 512, 8)
    kernel = functools.partial(_layernorm_kernel, eps=eps)
    return pl.pallas_call(
        kernel,
        grid=(M // tm,),
        in_specs=[
            pl.BlockSpec((tm, H), lambda i: (i, 0)),
            pl.BlockSpec((1, H), lambda i: (0, 0)),
            pl.BlockSpec((1, H), lambda i: (0, 0)),
        ],
        out_specs=pl.BlockSpec((tm, H), lambda i: (i, 0)),
        out_shape=jax.ShapeDtypeStruct((M, H), out_dtype),
        compiler_params=_cparams("parallel"),
    )(x, gamma.reshape(1, H), beta.reshape(1, H))


def _attention_block_kernel(qkv_ref, mask_ref, res_ref, wo_ref, bo_ref, g_ref,
                            b_ref, o_ref, *, num_heads, head_dim, scale, eps):
    """All heads of one batch element: attention + out-proj + residual + LN."""
    S = qkv_ref.shape[0]
    H = num_heads * head_dim
    qkv = qkv_ref[...]                                      # [S, 3H] bf16
    wo = wo_ref[...]                                        # [H, H]  bf16
    # additive key mask built in-kernel from the [1, S] attention mask row
    neg = (1.0 - mask_ref[0].astype(jnp.float32)) * -1e9    # [1, S]

    out = jnp.zeros((S, H), jnp.float32)
    for h in range(num_heads):
        q = qkv[:, h * head_dim:(h + 1) * head_dim]                      # [S, D]
        k = qkv[:, H + h * head_dim:H + (h + 1) * head_dim]              # [S, D]
        v = qkv[:, 2 * H + h * head_dim:2 * H + (h + 1) * head_dim]      # [S, D]
        s = jax.lax.dot_general(q, k, (((1,), (1,)), ((), ())),
                                preferred_element_type=jnp.float32)
        s = s * scale + neg                                              # [S, S]
        s = s - jnp.max(s, axis=-1, keepdims=True)
        p = jnp.exp(s)
        p = p * pl.reciprocal(jnp.sum(p, axis=-1, keepdims=True), approx=True)
        ctx = jnp.dot(p.astype(v.dtype), v,
                      preferred_element_type=jnp.float32)                # [S, D]
        # per-head slice of the output projection == concat(ctx_h) @ wo
        out = out + jnp.dot(ctx.astype(wo.dtype),
                            wo[h * head_dim:(h + 1) * head_dim, :],
                            preferred_element_type=jnp.float32)

    out = out + bo_ref[...] + res_ref[...].astype(jnp.float32)
    mu = jnp.mean(out, axis=-1, keepdims=True)
    var = jnp.mean(jnp.square(out - mu), axis=-1, keepdims=True)
    xn = (out - mu) * jax.lax.rsqrt(var + eps)
    o_ref[...] = (xn * g_ref[...] + b_ref[...]).astype(o_ref.dtype)


def attention_block(qkv, mask_b1s, h_resid, wo, bo, ln_g, ln_b, *, batch, seq,
                    num_heads, head_dim, eps):
    """qkv:[B*S,3H], mask:[B,1,S], h_resid:[B*S,H] -> LN(attn_out + h_resid)."""
    M, H = h_resid.shape
    scale = 1.0 / float(head_dim) ** 0.5
    kernel = functools.partial(_attention_block_kernel, num_heads=num_heads,
                               head_dim=head_dim, scale=scale, eps=eps)
    return pl.pallas_call(
        kernel,
        grid=(batch,),
        in_specs=[
            pl.BlockSpec((seq, 3 * H), lambda b: (b, 0)),
            pl.BlockSpec((1, 1, seq), lambda b: (b, 0, 0)),
            pl.BlockSpec((seq, H), lambda b: (b, 0)),
            pl.BlockSpec((H, H), lambda b: (0, 0)),
            pl.BlockSpec((1, H), lambda b: (0, 0)),
            pl.BlockSpec((1, H), lambda b: (0, 0)),
            pl.BlockSpec((1, H), lambda b: (0, 0)),
        ],
        out_specs=pl.BlockSpec((seq, H), lambda b: (b, 0)),
        out_shape=jax.ShapeDtypeStruct((M, H), h_resid.dtype),
        compiler_params=_cparams("parallel"),
    )(qkv, mask_b1s, h_resid, wo, bo.reshape(1, H),
      ln_g.reshape(1, H), ln_b.reshape(1, H))


def _ffn_block_kernel(x_ref, w1_ref, b1_ref, w2_ref, b2_ref, g_ref, b_ref,
                      o_ref, *, eps):
    """Fused FFN: GELU(x@w1+b1)@w2+b2 + residual(x), then LayerNorm."""
    x = x_ref[...]                                                   # [tm, H] bf16
    h1 = jnp.dot(x, w1_ref[...], preferred_element_type=jnp.float32) + b1_ref[...]
    # TODO(synk): HF DistilBERT uses exact erf GELU; tanh approximation used here.
    h1 = jax.nn.gelu(h1, approximate=True)
    h2 = jnp.dot(h1.astype(w2_ref.dtype), w2_ref[...],
                 preferred_element_type=jnp.float32) + b2_ref[...]
    y = h2 + x.astype(jnp.float32)
    mu = jnp.mean(y, axis=-1, keepdims=True)
    var = jnp.mean(jnp.square(y - mu), axis=-1, keepdims=True)
    yn = (y - mu) * jax.lax.rsqrt(var + eps)
    o_ref[...] = (yn * g_ref[...] + b_ref[...]).astype(o_ref.dtype)


def ffn_block(x, w1, b1, w2, b2, ln_g, ln_b, eps):
    M, H = x.shape
    F = w1.shape[1]
    tm = _pick_tile(M, 256, 16)
    kernel = functools.partial(_ffn_block_kernel, eps=eps)
    return pl.pallas_call(
        kernel,
        grid=(M // tm,),
        in_specs=[
            pl.BlockSpec((tm, H), lambda i: (i, 0)),
            pl.BlockSpec((H, F), lambda i: (0, 0)),
            pl.BlockSpec((1, F), lambda i: (0, 0)),
            pl.BlockSpec((F, H), lambda i: (0, 0)),
            pl.BlockSpec((1, H), lambda i: (0, 0)),
            pl.BlockSpec((1, H), lambda i: (0, 0)),
            pl.BlockSpec((1, H), lambda i: (0, 0)),
        ],
        out_specs=pl.BlockSpec((tm, H), lambda i: (i, 0)),
        out_shape=jax.ShapeDtypeStruct((M, H), x.dtype),
        compiler_params=_cparams("parallel"),
    )(x, w1, b1.reshape(1, F), w2, b2.reshape(1, H),
      ln_g.reshape(1, H), ln_b.reshape(1, H))


def _classifier_kernel(x_ref, w1_ref, b1_ref, w2_ref, b2_ref, w3_ref, b3_ref,
                       o_ref):
    """Fused classifier head: hidden -> 512 -> ReLU -> 256 -> ReLU -> num_labels."""
    x = x_ref[...]
    h1 = jnp.maximum(jnp.dot(x, w1_ref[...],
                             preferred_element_type=jnp.float32) + b1_ref[...], 0.0)
    h2 = jnp.maximum(jnp.dot(h1.astype(w2_ref.dtype), w2_ref[...],
                             preferred_element_type=jnp.float32) + b2_ref[...], 0.0)
    logits = jnp.dot(h2.astype(w3_ref.dtype), w3_ref[...],
                     preferred_element_type=jnp.float32) + b3_ref[...]
    o_ref[...] = logits.astype(o_ref.dtype)


def classifier_head(pooled, w1, b1, w2, b2, w3, b3):
    B, H = pooled.shape
    N1, N2, NL = w1.shape[1], w2.shape[1], w3.shape[1]
    return pl.pallas_call(
        _classifier_kernel,
        grid=(1,),
        in_specs=[
            pl.BlockSpec((B, H), lambda i: (0, 0)),
            pl.BlockSpec((H, N1), lambda i: (0, 0)),
            pl.BlockSpec((1, N1), lambda i: (0, 0)),
            pl.BlockSpec((N1, N2), lambda i: (0, 0)),
            pl.BlockSpec((1, N2), lambda i: (0, 0)),
            pl.BlockSpec((N2, NL), lambda i: (0, 0)),
            pl.BlockSpec((1, NL), lambda i: (0, 0)),
        ],
        out_specs=pl.BlockSpec((B, NL), lambda i: (0, 0)),
        out_shape=jax.ShapeDtypeStruct((B, NL), jnp.float32),
        compiler_params=_cparams(),
    )(pooled, w1, b1.reshape(1, N1), w2, b2.reshape(1, N2), w3, b3.reshape(1, NL))


# --------------------------- Model (params + fwd) --------------------------- #

class Config:
    vocab_size = 64
    max_pos = 32
    hidden = 128          # lane-dense stand-in for 768
    heads = 2
    head_dim = 64
    ffn = 256
    layers = 2
    num_labels = 4
    ln_eps = 1e-12


def init_params(cfg, key):
    wdt = jnp.bfloat16    # matmul weights stored bf16 (MXU native); vector params f32

    def nrm(k, shape, scale=0.02, dtype=jnp.float32):
        return (scale * jax.random.normal(k, shape, dtype=jnp.float32)).astype(dtype)

    keys = iter(jax.random.split(key, 128))
    p = {
        "word_emb": nrm(next(keys), (cfg.vocab_size, cfg.hidden)),
        "pos_emb": nrm(next(keys), (cfg.max_pos, cfg.hidden)),
        "emb_ln_g": jnp.ones((cfg.hidden,), jnp.float32),
        "emb_ln_b": jnp.zeros((cfg.hidden,), jnp.float32),
        "layers": [],
    }
    for _ in range(cfg.layers):
        lyr = {
            # fused QKV projection: [H, 3H] (== concat of wq|wk|wv column-wise)
            "w_qkv": nrm(next(keys), (cfg.hidden, 3 * cfg.hidden), dtype=wdt),
            "b_qkv": jnp.zeros((3 * cfg.hidden,), jnp.float32),
            "wo": nrm(next(keys), (cfg.hidden, cfg.hidden), dtype=wdt),
            "bo": jnp.zeros((cfg.hidden,), jnp.float32),
            "ln1_g": jnp.ones((cfg.hidden,), jnp.float32),
            "ln1_b": jnp.zeros((cfg.hidden,), jnp.float32),
            "w1": nrm(next(keys), (cfg.hidden, cfg.ffn), dtype=wdt),
            "b1": jnp.zeros((cfg.ffn,), jnp.float32),
            "w2": nrm(next(keys), (cfg.ffn, cfg.hidden), dtype=wdt),
            "b2": jnp.zeros((cfg.hidden,), jnp.float32),
            "ln2_g": jnp.ones((cfg.hidden,), jnp.float32),
            "ln2_b": jnp.zeros((cfg.hidden,), jnp.float32),
        }
        p["layers"].append(lyr)
    # classifier: hidden -> 512 -> ReLU -> 256 -> ReLU -> num_labels
    p["c1_w"] = nrm(next(keys), (cfg.hidden, 512), dtype=wdt)
    p["c1_b"] = jnp.zeros((512,), jnp.float32)
    p["c2_w"] = nrm(next(keys), (512, 256), dtype=wdt)
    p["c2_b"] = jnp.zeros((256,), jnp.float32)
    p["c3_w"] = nrm(next(keys), (256, cfg.num_labels), dtype=wdt)
    p["c3_b"] = jnp.zeros((cfg.num_labels,), jnp.float32)
    return p


def mbti_transformer_forward(params, input_ids, attention_mask, cfg):
    B, S = input_ids.shape
    H = cfg.hidden

    # --- embeddings (gather is glue; LayerNorm is a Pallas kernel) ---
    tok = jnp.take(params["word_emb"], input_ids, axis=0)          # [B,S,H] f32
    pos = params["pos_emb"][:S][None, :, :]                        # [1,S,H]
    emb = (tok + pos).reshape(B * S, H)
    h = layernorm(emb, params["emb_ln_g"], params["emb_ln_b"], cfg.ln_eps,
                  out_dtype=jnp.bfloat16)                          # [B*S,H] bf16
    # dropout -> identity at eval

    # [B,1,S] float mask; the additive -1e9 mask is built inside the attention kernel
    mask_b1s = attention_mask.astype(jnp.float32).reshape(B, 1, S)

    for lyr in params["layers"]:
        # fused Q/K/V projection (single tiled matmul) -> [B*S, 3H]
        qkv = linear(h, lyr["w_qkv"], lyr["b_qkv"])
        # attention (all heads per batch element) + out-proj + residual + LN1
        h = attention_block(qkv, mask_b1s, h, lyr["wo"], lyr["bo"],
                            lyr["ln1_g"], lyr["ln1_b"],
                            batch=B, seq=S, num_heads=cfg.heads,
                            head_dim=cfg.head_dim, eps=cfg.ln_eps)
        # fused FFN (w1 + GELU + w2) + residual + LN2
        h = ffn_block(h, lyr["w1"], lyr["b1"], lyr["w2"], lyr["b2"],
                      lyr["ln2_g"], lyr["ln2_b"], cfg.ln_eps)

    # pooled_output = last_hidden_state[:, 0]  (cheap strided slice in glue)
    pooled = h.reshape(B, S, H)[:, 0]                              # [B,H] bf16
    # self.dropout(0.3) and classifier-internal dropouts -> identity at eval

    logits = classifier_head(pooled, params["c1_w"], params["c1_b"],
                             params["c2_w"], params["c2_b"],
                             params["c3_w"], params["c3_b"])
    return logits                                                  # [B, num_labels] f32


# ---------------------------------- main ------------------------------------ #

if __name__ == "__main__":
    cfg = Config()
    key = jax.random.PRNGKey(0)
    k_param, k_ids = jax.random.split(key)

    B, S = 2, 16
    params = init_params(cfg, k_param)
    input_ids = jax.random.randint(k_ids, (B, S), 0, cfg.vocab_size, dtype=jnp.int32)
    attention_mask = jnp.ones((B, S), dtype=jnp.int32)

    logits = mbti_transformer_forward(params, input_ids, attention_mask, cfg)
    jax.block_until_ready(logits)
    assert logits.shape == (B, cfg.num_labels)
    assert bool(jnp.all(jnp.isfinite(logits)))
    print("KERNEL_OK")
</pallas_src>

<mosaic_0001>
module attributes {stable_mosaic.version = 11 : i64} {
  func.func @_layernorm_kernel(%arg0: i32, %arg1: memref<32x128xf32, #tpu.memory_space<vmem>>, %arg2: memref<1x128xf32, #tpu.memory_space<vmem>>, %arg3: memref<1x128xf32, #tpu.memory_space<vmem>>, %arg4: memref<32x128xbf16, #tpu.memory_space<vmem>>) attributes {dimension_semantics = [#tpu.dimension_semantics<parallel>], iteration_bounds = array<i64: 1>, scalar_prefetch = 0 : i64, scratch_operands = 0 : i64, tpu.core_type = #tpu.core_type<tc>, window_params = [{transform_indices = @transform_0, window_bounds = array<i64: 32, 128>}, {pipeline_mode = #tpu.pipeline_mode<synchronous>, transform_indices = @transform_1, window_bounds = array<i64: 1, 128>}, {pipeline_mode = #tpu.pipeline_mode<synchronous>, transform_indices = @transform_2, window_bounds = array<i64: 1, 128>}, {transform_indices = @transform_3, window_bounds = array<i64: 32, 128>}]} {
    %c0 = arith.constant 0 : index
    %c0_0 = arith.constant 0 : index
    %0 = vector.load %arg1[%c0, %c0_0] : memref<32x128xf32, #tpu.memory_space<vmem>>, vector<32x128xf32>
    %cst = arith.constant dense<0.000000e+00> : vector<32xf32>
    %1 = vector.multi_reduction <add>, %0, %cst [1] : vector<32x128xf32> to vector<32xf32>
    %2 = vector.shape_cast %1 : vector<32xf32> to vector<32x1xf32>
    %cst_1 = arith.constant 1.280000e+02 : f32
    %3 = vector.broadcast %cst_1 : f32 to vector<32x1xf32>
    %4 = arith.divf %2, %3 : vector<32x1xf32>
    %5 = vector.broadcast %4 : vector<32x1xf32> to vector<32x128xf32>
    %6 = arith.subf %0, %5 : vector<32x128xf32>
    %7 = arith.mulf %6, %6 : vector<32x128xf32>
    %cst_2 = arith.constant dense<0.000000e+00> : vector<32xf32>
    %8 = vector.multi_reduction <add>, %7, %cst_2 [1] : vector<32x128xf32> to vector<32xf32>
    %9 = vector.shape_cast %8 : vector<32xf32> to vector<32x1xf32>
    %cst_3 = arith.constant 1.280000e+02 : f32
    %10 = vector.broadcast %cst_3 : f32 to vector<32x1xf32>
    %11 = arith.divf %9, %10 : vector<32x1xf32>
    %12 = vector.broadcast %4 : vector<32x1xf32> to vector<32x128xf32>
    %13 = arith.subf %0, %12 : vector<32x128xf32>
    %cst_4 = arith.constant 9.99999996E-13 : f32
    %14 = vector.broadcast %cst_4 : f32 to vector<32x1xf32>
    %15 = arith.addf %11, %14 : vector<32x1xf32>
    %16 = math.rsqrt %15 : vector<32x1xf32>
    %17 = vector.broadcast %16 : vector<32x1xf32> to vector<32x128xf32>
    %18 = arith.mulf %13, %17 : vector<32x128xf32>
    %c0_5 = arith.constant 0 : index
    %c0_6 = arith.constant 0 : index
    %19 = vector.load %arg2[%c0_5, %c0_6] : memref<1x128xf32, #tpu.memory_space<vmem>>, vector<1x128xf32>
    %20 = vector.broadcast %19 : vector<1x128xf32> to vector<32x128xf32>
    %21 = arith.mulf %18, %20 : vector<32x128xf32>
    %c0_7 = arith.constant 0 : index
    %c0_8 = arith.constant 0 : index
    %22 = vector.load %arg3[%c0_7, %c0_8] : memref<1x128xf32, #tpu.memory_space<vmem>>, vector<1x128xf32>
    %23 = vector.broadcast %22 : vector<1x128xf32> to vector<32x128xf32>
    %24 = arith.addf %21, %23 : vector<32x128xf32>
    %25 = arith.truncf %24 : vector<32x128xf32> to vector<32x128xbf16>
    %c0_9 = arith.constant 0 : index
    %c0_10 = arith.constant 0 : index
    %26 = vector.load %arg4[%c0_9, %c0_10] : memref<32x128xbf16, #tpu.memory_space<vmem>>, vector<32x128xbf16>
    tpu.vector_store %arg4[%c0_9, %c0_10], %25 {strides = array<i32>} : memref<32x128xbf16, #tpu.memory_space<vmem>>, vector<32x128xbf16>,
    return
  }
  func.func @transform_0(%arg0: i32) -> (i32, i32) {
    %c0_i32 = arith.constant 0 : i32
    %c0_i32_0 = arith.constant 0 : i32
    return %arg0, %c0_i32 : i32, i32
  }
  func.func @transform_1(%arg0: i32) -> (i32, i32) {
    %c0_i32 = arith.constant 0 : i32
    %c0_i32_0 = arith.constant 0 : i32
    %c0_i32_1 = arith.constant 0 : i32
    return %c0_i32, %c0_i32_0 : i32, i32
  }
  func.func @transform_2(%arg0: i32) -> (i32, i32) {
    %c0_i32 = arith.constant 0 : i32
    %c0_i32_0 = arith.constant 0 : i32
    %c0_i32_1 = arith.constant 0 : i32
    return %c0_i32, %c0_i32_0 : i32, i32
  }
  func.func @transform_3(%arg0: i32) -> (i32, i32) {
    %c0_i32 = arith.constant 0 : i32
    %c0_i32_0 = arith.constant 0 : i32
    return %arg0, %c0_i32 : i32, i32
  }
}

</mosaic_0001>

<bundles_post_ra>
// kernel: tpu_custom_call.1
= control target key start
LH: loop header
LB: loop body
LE: loop exit
PB: predicated region body
PF: predicated region fallthrough
CT: control target
= control target key end

     0   :  { %8 = vsyncpa [#allocation3], 0  ;;  %s276_s0 = inlined_call_operand.hbm [shape: f32[32,128], index: 0, kind: input, shape index: {}]   ;;  %s277_s1 = inlined_call_operand.vmem [shape: f32[1,128], index: 1, kind: input, shape index: {}]   ;;  %s278_s2 = inlined_call_operand.vmem [shape: f32[1,128], index: 2, kind: input, shape index: {}]   ;;  %s279_s3 = inlined_call_operand.hbm [shape: bf16[32,128], index: 3, kind: output, shape index: {}]  }
   0x1   :  { %9 = vsyncpa [#allocation4], 0  ;;  %s220_s12 = smov [#allocation2]   ;;  %s172_s16 = scalar_lea.hbm %s276_s0, 512 }
   0x2   :  { %s15_s13 = sshll.u32 %s220_s12, 4  ;;  %p173_p0 = scmp.ne.s32.totalorder %s276_s0, %s172_s16  ;;  %s16_s13 = int_to_ptr.vmem [resolvable:$true] %s15_s13 }
   0x3   :  { %p176_p1 = scmp.lt.u32.totalorder %s172_s16, %s276_s0 }
   0x5   :  { %p178_p2 = pnand %p176_p1, %p173_p0 }
   0x7   :  { %181 = shalt.err (!%p178_p2)
}
   0x8   :  { %s182_s21 = scalar_lea.vmem %s16_s13, 512  ;;  %p187_p4 = scmp.lt.s32.totalorder %s16_s13, %s16_s13 }
   0x9   :  { %p183_p3 = scmp.ne.s32.totalorder %s16_s13, %s182_s21  ;;  %p188_p5 = scmp.lt.s32.totalorder %s182_s21, %s182_s21 }
   0xb   :  { %p189_p6 = por %p188_p5, %p187_p4 }
   0xd   :  { %p190_p7 = pnand %p189_p6, %p183_p3 }
   0xf   :  { %193 = shalt.err (!%p190_p7)
}
  0x10   :  { %s221_s22 = smov 128   ;;  %s222_s23 = smov 8  }
  0x11   :  { %21 = dma.hbm_to_vmem [thread:$0]  %s276_s0, 512, %s16_s13, [#allocation3], %s221_s22, %s221_s22, %s222_s23  }
  0x12   :  { %216 = dma.done.wait [#allocation3], 512  }
  0x13   :  { %217 = vsyncadd [#allocation3], 4294966784  ;;  %v29_v0 = vld [vmem:[#allocation2] sm:$0xff]  ;;  %v31_v1 = vld [vmem:[#allocation2 + $0x10] sm:$0xff]  ;;  %s223_s29 = smov [#allocation5]  }
  0x14   :  { %33 = vadd.xlane.f32.xlu0 %v29_v0  ;;  %37 = vadd.xlane.f32.xlu1 %v31_v1  ;;  %v30_v2 = vld [vmem:[#allocation2 + $0x8] sm:$0xff]  ;;  %v32_v3 = vld [vmem:[#allocation2 + $0x18] sm:$0xff]  ;;  %v137_v34 = vld [vmem:[%s277_s1] ss:$0 sm:$0xff]  ;;  %s125_s30 = sshll.u32 %s223_s29, 4  ;;  %s126_s30 = int_to_ptr.vmem [resolvable:$true] %s125_s30 }
  0x15   :  { %v138_v40 = vld [vmem:[%s278_s2] ss:$0 sm:$0xff]  ;;  %s194_s1 = scalar_lea.vmem %s126_s30, 256  ;;  %p199_p9 = scmp.lt.s32.totalorder %s126_s30, %s126_s30 }
  0x16   :  { %p195_p8 = scmp.ne.s32.totalorder %s126_s30, %s194_s1  ;;  %p200_p10 = scmp.lt.s32.totalorder %s194_s1, %s194_s1 }
  0x18   :  { %35 = vadd.xlane.f32.xlu0 %v30_v2  ;;  %39 = vadd.xlane.f32.xlu1 %v32_v3  ;;  %p201_p11 = por %p200_p10, %p199_p9 }
  0x1a   :  { %p202_p12 = pnand %p201_p11, %p195_p8 }
  0xa1   :  { %v34_v4 = vpop.xlane.xlu0 %33  ;;  %v38_v5 = vpop.xlane.xlu1 %37 }
  0xa2   :  { %v42_v6 = vmul.f32 0.0078125, %v34_v4  ;;  %v44_v7 = vmul.f32 0.0078125, %v38_v5 }
  0xa4   :  { %v46_v8 = vsub.f32 %v29_v0, %v42_v6  ;;  %v48_v9 = vsub.f32 %v31_v1, %v44_v7 }
  0xa5   :  { %v36_v10 = vpop.xlane.xlu0 %35  ;;  %v40_v11 = vpop.xlane.xlu1 %39 }
  0xa6   :  { %v43_v12 = vmul.f32 0.0078125, %v36_v10  ;;  %v50_v13 = vmul.f32 %v46_v8, %v46_v8  ;;  %v45_v14 = vmul.f32 0.0078125, %v40_v11  ;;  %v52_v17 = vmul.f32 %v48_v9, %v48_v9 }
  0xa8   :  { %v47_v15 = vsub.f32 %v30_v2, %v43_v12  ;;  %54 = vadd.xlane.f32.xlu0 %v50_v13  ;;  %v49_v16 = vsub.f32 %v32_v3, %v45_v14 }
  0xaa   :  { %v51_v18 = vmul.f32 %v47_v15, %v47_v15  ;;  %v53_v19 = vmul.f32 %v49_v16, %v49_v16 }
  0xac   :  { %58 = vadd.xlane.f32.xlu0 %v52_v17  ;;  %56 = vadd.xlane.f32.xlu1 %v51_v18 }
  0xb0   :  { %60 = vadd.xlane.f32.xlu1 %v53_v19 }
 0x135   :  { %v55_v20 = vpop.xlane.xlu0 %54 }
 0x136   :  { %v62_v21 = vmul.f32 0.0078125, %v55_v20 }
 0x138   :  { %v66_v22 = vadd.f32 1e-12, %v62_v21 }
 0x139   :  { %v57_v23 = vpop.xlane.xlu1 %56  ;;  %v59_v24 = vpop.xlane.xlu0 %58 }
 0x13a   :  { %164 = vrsqrt.f32 %v66_v22  ;;  %v63_v25 = vmul.f32 0.0078125, %v57_v23  ;;  %v64_v26 = vmul.f32 0.0078125, %v59_v24 }
 0x13c   :  { %v67_v27 = vadd.f32 1e-12, %v63_v25  ;;  %v68_v28 = vadd.f32 1e-12, %v64_v26 }
 0x13d   :  { %v61_v29 = vpop.xlane.xlu1 %60 }
 0x13e   :  { %166 = vrsqrt.f32 %v67_v27  ;;  %v65_v30 = vmul.f32 0.0078125, %v61_v29 }
 0x13f   :  { %168 = vrsqrt.f32 %v68_v28 }
 0x140   :  { %v69_v31 = vadd.f32 1e-12, %v65_v30 }
 0x142   :  { %170 = vrsqrt.f32 %v69_v31 }
 0x144   :  { %v165_v32 = vpop.eup %164 }
 0x145   :  { %v74_v33 = vmul.f32 %v165_v32, %v46_v8 }
 0x147   :  { %v85_v38 = vmul.f32 %v137_v34, %v74_v33 }
 0x148   :  { %v167_v35 = vpop.eup %166 }
 0x149   :  { %v169_v36 = vpop.eup %168  ;;  %v75_v37 = vmul.f32 %v167_v35, %v47_v15  ;;  %v96_v45 = vadd.f32 %v138_v40, %v85_v38 }
 0x14a   :  { %v76_v39 = vmul.f32 %v169_v36, %v48_v9 }
 0x14b   :  { %v86_v41 = vmul.f32 %v137_v34, %v75_v37 }
 0x14c   :  { %v171_v42 = vpop.eup %170  ;;  %v87_v43 = vmul.f32 %v137_v34, %v76_v39 }
 0x14d   :  { %v77_v44 = vmul.f32 %v171_v42, %v49_v16  ;;  %v97_v46 = vadd.f32 %v138_v40, %v86_v41 }
 0x14e   :  { %v98_v49 = vadd.f32 %v138_v40, %v87_v43 }
 0x14f   :  { %v88_v47 = vmul.f32 %v137_v34, %v77_v44  ;;  %v150_v48 = vpack.c.bf16 %v97_v46, %v96_v45 }
 0x151   :  { %v99_v50 = vadd.f32 %v138_v40, %v88_v47  ;;  %151 = vst [vmem:[#allocation5] sm:$0xff] %v150_v48  }
 0x153   :  { %v155_v51 = vpack.c.bf16 %v99_v50, %v98_v49 }
 0x155   :  { %157 = vst [vmem:[#allocation5 + $0x8] sm:$0xff] %v155_v51  }
 0x156   :  { %205 = shalt.err (!%p202_p12)
}
 0x157   :  { %s206_s5 = scalar_lea.hbm %s279_s3, 256 }
 0x158   :  { %p207_p13 = scmp.ne.s32.totalorder %s279_s3, %s206_s5  ;;  %p210_p0 = scmp.lt.u32.totalorder %s206_s5, %s279_s3 }
 0x15a   :  { %p212_p1 = pnand %p210_p0, %p207_p13 }
 0x15c   :  { %215 = shalt.err (!%p212_p1)
}
 0x15d   :  { %s224_s10 = smov 64   ;;  %s225_s11 = smov 4  }
 0x15e   :  { %131 = dma.vmem_to_hbm [thread:$0]  %s126_s30, 256, %s279_s3, [#allocation4], %s224_s10, %s224_s10, %s225_s11  }
 0x15f   :  { %218 = dma.done.wait [#allocation4], 256  }
 0x160   :  { %219 = vsyncadd [#allocation4], 4294967040 }
 0x161   :  { %135 = vsyncpa [#allocation3], 1 }
 0x162   :  { %136 = vsyncpa [#allocation4], 1 }

</bundles_post_ra>
